<compile_context>
chip_gen: v7x
topology: tpu7x:2x2x1
jax: 0.10.0
libtpu: 0.0.40
codegen_flags: <defaults>
</compile_context>

<pallas_src>
import numpy as np
import jax
import jax.numpy as jnp
from jax.experimental import pallas as pl
from jax.experimental.pallas import tpu as pltpu


# ----------------------------------------------------------------------------
# Synthetic grammar (deterministic, built in-script)
# ----------------------------------------------------------------------------
RULES_BY_SYMBOL = {
    1: [0, 1, 2],
    2: [3],
    3: [4, 5],
    4: [6, 7, 8, 9],
    5: [10],
    6: [11, 12],
}
NSYMBOLS = len(RULES_BY_SYMBOL)                                       # 6
NRULES = max(r for rs in RULES_BY_SYMBOL.values() for r in rs) + 1    # 13
MAX_RULES = max(len(rs) for rs in RULES_BY_SYMBOL.values())           # 4
DEMB = 32


def build_buffers():
    """rule_mapping / rule_mask buffers, exactly as the PyTorch __init__."""
    rule_mapping = np.zeros((NSYMBOLS + 1, MAX_RULES), dtype=np.int32)
    rule_mask = np.zeros((NSYMBOLS + 1, MAX_RULES), dtype=np.float32)
    for symbol in range(1, NSYMBOLS + 1):
        rids = np.asarray(RULES_BY_SYMBOL[symbol], dtype=np.int32)
        rule_mapping[symbol, : len(rids)] = rids
        rule_mask[symbol, len(rids):] = -np.inf
    return jnp.asarray(rule_mapping), jnp.asarray(rule_mask)


def _round_up(x, m):
    return ((x + m - 1) // m) * m


# ----------------------------------------------------------------------------
# Pallas kernel
# ----------------------------------------------------------------------------
def rule_logits_kernel(emb_t_ref, sym_ref, tokneg_ref, table_ref, rmask_ref,
                       out_ref):
    """One token tile (tokens live on the 128-lane axis everywhere).

    emb_t_ref:  (D, TT)       bf16  embeddings, contraction dim on sublanes
    sym_ref:    (1, TT)       i32   grammar symbol per token
    tokneg_ref: (1, TT)       f32   0.0 (valid token) or -inf (masked token)
    table_ref:  (R*Spad, D)   bf16  stacked per-(rule-slot, symbol) embeddings
    rmask_ref:  (R*Spad, 1)   f32   matching additive rule mask (0 / -inf)
    out_ref:    (R, TT)       f32   logits, tokens on lanes (lane-dense stores)
    """
    # Single MXU matmul in native orientation (LHS K on lanes, RHS K on
    # sublanes):  symscores[r*Spad+s, t] = <rule_table[mapping[s, r]], emb[:, t]>
    symscores = jax.lax.dot_general(
        table_ref[...], emb_t_ref[...], (((1,), (0,)), ((), ())),
        preferred_element_type=jnp.float32)                 # (R*Spad, TT) f32

    # Fold the per-(symbol, rule-slot) additive mask (0 / -inf) in one pass.
    masked = symscores + rmask_ref[...]                     # (R*Spad, TT)

    nrows, tt = masked.shape
    nr = out_ref.shape[0]                                   # R
    spad = nrows // nr                                      # padded #symbols

    sym = sym_ref[...]                                      # (1, TT) i32
    tokneg = tokneg_ref[...]                                # (1, TT) f32

    # One-hot over the (small) symbol axis, built once and reused per slot.
    iota_s = jax.lax.broadcasted_iota(jnp.int32, (spad, tt), 0)
    sel = iota_s == sym                                     # (Spad, TT) bool

    # Static unroll over rule slots; each block slice lands on a sublane-tile
    # boundary (spad is a multiple of 8).  Rows are stored directly, no concat.
    for r in range(nr):
        block = masked[r * spad:(r + 1) * spad, :]          # (Spad, TT)
        row = jnp.sum(jnp.where(sel, block, 0.0),
                      axis=0, keepdims=True)                # (1, TT)
        out_ref[r:r + 1, :] = row + tokneg


def grammar_rule_mapper_forward(symbols, embeddings, token_mask,
                                rule_table, rule_mapping, rule_mask,
                                *, max_token_tile=4096):
    """symbols (B,S) int32, embeddings (B,S,D) f32, token_mask (B,S) bool."""
    B, S = symbols.shape
    D = embeddings.shape[-1]
    nsym1, R = rule_mapping.shape
    T = B * S

    # rule_ids is a module output; keep the cheap wrapper gather for it.
    rule_ids = rule_mapping[symbols].astype(jnp.int32)              # (B, S, R)

    # ---- tiling: multiple of 128 lanes, >=2 tiles when T allows (v7x) ------
    cap = max(128, (int(max_token_tile) // 128) * 128)
    token_tile = min(cap, _round_up(pl.cdiv(T, 2), 128))
    num_tiles = pl.cdiv(T, token_tile)
    T_pad = num_tiles * token_tile
    pad = T_pad - T

    # ---- per-token streams (tokens on the last / lane axis) ----------------
    emb_flat = embeddings.reshape(T, D)
    sym_flat = symbols.reshape(T).astype(jnp.int32)
    tok_neg = jnp.where(token_mask.reshape(T), 0.0, -jnp.inf).astype(jnp.float32)
    if pad:
        emb_flat = jnp.pad(emb_flat, ((0, pad), (0, 0)))
        sym_flat = jnp.pad(sym_flat, (0, pad))
        tok_neg = jnp.pad(tok_neg, (0, pad))
    # cast + transpose fused in one XLA pass: (T_pad, D) f32 -> (D, T_pad) bf16
    emb_t = emb_flat.astype(jnp.bfloat16).T
    sym_2d = sym_flat.reshape(1, T_pad)
    tokneg_2d = tok_neg.reshape(1, T_pad)

    # ---- tiny stacked per-(rule-slot, symbol) tables (a few KiB) -----------
    spad = _round_up(nsym1, 8)
    gathered = rule_table.astype(jnp.bfloat16)[rule_mapping]        # (nsym1,R,D)
    gathered = jnp.transpose(gathered, (1, 0, 2))                   # (R,nsym1,D)
    gathered = jnp.pad(gathered, ((0, 0), (0, spad - nsym1), (0, 0)))
    stacked_table = gathered.reshape(R * spad, D)                   # (R*Spad, D)

    rmask_t = jnp.transpose(rule_mask.astype(jnp.float32), (1, 0))  # (R, nsym1)
    rmask_t = jnp.pad(rmask_t, ((0, 0), (0, spad - nsym1)))
    rmask_stacked = rmask_t.reshape(R * spad, 1)                    # (R*Spad, 1)

    out_packed = pl.pallas_call(
        rule_logits_kernel,
        out_shape=jax.ShapeDtypeStruct((num_tiles, R, token_tile), jnp.float32),
        grid_spec=pltpu.PrefetchScalarGridSpec(
            num_scalar_prefetch=0,
            grid=(num_tiles,),
            in_specs=[
                pl.BlockSpec((D, token_tile), lambda i: (0, i)),       # emb_t
                pl.BlockSpec((1, token_tile), lambda i: (0, i)),       # symbols
                pl.BlockSpec((1, token_tile), lambda i: (0, i)),       # token mask
                pl.BlockSpec((R * spad, D), lambda i: (0, 0)),         # stacked tbl
                pl.BlockSpec((R * spad, 1), lambda i: (0, 0)),         # rule mask
            ],
            out_specs=pl.BlockSpec((None, R, token_tile), lambda i: (i, 0, 0)),
        ),
        compiler_params=pltpu.CompilerParams(
            dimension_semantics=("parallel",)),
    )(emb_t, sym_2d, tokneg_2d, stacked_table, rmask_stacked)

    # Unpack: (num_tiles, R, token_tile) -> (T, R) -> (B, S, R).
    logits = (out_packed.transpose(0, 2, 1)
              .reshape(T_pad, R)[:T]
              .reshape(B, S, R))
    return logits, rule_ids


# ----------------------------------------------------------------------------
# Pure-JAX reference (for correctness check)
# ----------------------------------------------------------------------------
def reference_forward(symbols, embeddings, token_mask,
                      rule_table, rule_mapping, rule_mask):
    rule_ids = rule_mapping[symbols]                          # (B, S, R)
    rule_embs = rule_table[rule_ids]                          # (B, S, R, D)
    mask = rule_mask[symbols]
    mask = jnp.where(token_mask[..., None], mask, -jnp.inf)
    logits = jnp.sum(embeddings[:, :, None, :] * rule_embs, axis=-1) + mask
    return logits, rule_ids


if __name__ == "__main__":
    key = jax.random.PRNGKey(0)
    k_emb, k_tab, k_sym, k_msk = jax.random.split(key, 4)

    B, S = 2, 8

    # Deterministic "parameters".  (PyTorch __init__ zero-inits the embedding
    # weight; use random values so the matmul path is actually exercised.)
    rule_table = jax.random.normal(k_tab, (NRULES, DEMB), dtype=jnp.float32)
    rule_mapping, rule_mask = build_buffers()

    symbols = jax.random.randint(k_sym, (B, S), 0, NSYMBOLS + 1, dtype=jnp.int32)
    embeddings = jax.random.normal(k_emb, (B, S, DEMB), dtype=jnp.float32)
    token_mask = jax.random.bernoulli(k_msk, 0.75, (B, S))

    fwd = jax.jit(grammar_rule_mapper_forward)
    logits, rule_ids = fwd(symbols, embeddings, token_mask,
                           rule_table, rule_mapping, rule_mask)
    logits = jax.block_until_ready(logits)
    rule_ids = jax.block_until_ready(rule_ids)

    # Quantization-matched reference: the kernel feeds bf16 inputs to the MXU
    # with f32 accumulation, so compare against a reference built from the same
    # bf16-rounded inputs (f32 math).
    ref_logits, ref_ids = reference_forward(
        symbols,
        embeddings.astype(jnp.bfloat16).astype(jnp.float32),
        token_mask,
        rule_table.astype(jnp.bfloat16).astype(jnp.float32),
        rule_mapping, rule_mask)

    np.testing.assert_array_equal(np.asarray(rule_ids), np.asarray(ref_ids))
    np.testing.assert_allclose(np.asarray(logits), np.asarray(ref_logits),
                               rtol=1e-3, atol=1e-3)
    print("KERNEL_OK")
</pallas_src>

<mosaic_0001>
module attributes {stable_mosaic.version = 11 : i64} {
  func.func @rule_logits_kernel(%arg0: i32, %arg1: memref<32x128xbf16, #tpu.memory_space<vmem>>, %arg2: memref<1x128xi32, #tpu.memory_space<vmem>>, %arg3: memref<1x128xf32, #tpu.memory_space<vmem>>, %arg4: memref<32x32xbf16, #tpu.memory_space<vmem>>, %arg5: memref<32x1xf32, #tpu.memory_space<vmem>>, %arg6: memref<1x4x128xf32, #tpu.memory_space<vmem>>) attributes {dimension_semantics = [#tpu.dimension_semantics<parallel>], iteration_bounds = array<i64: 1>, scalar_prefetch = 0 : i64, scratch_operands = 0 : i64, tpu.core_type = #tpu.core_type<tc>, window_params = [{transform_indices = @transform_0, window_bounds = array<i64: 32, 128>}, {transform_indices = @transform_1, window_bounds = array<i64: 1, 128>}, {transform_indices = @transform_2, window_bounds = array<i64: 1, 128>}, {pipeline_mode = #tpu.pipeline_mode<synchronous>, transform_indices = @transform_3, window_bounds = array<i64: 32, 32>}, {pipeline_mode = #tpu.pipeline_mode<synchronous>, transform_indices = @transform_4, window_bounds = array<i64: 32, 1>}, {transform_indices = @transform_5, window_bounds = array<i64: 1, 4, 128>}]} {
    %c0 = arith.constant 0 : index
    %c0_0 = arith.constant 0 : index
    %0 = vector.load %arg4[%c0, %c0_0] : memref<32x32xbf16, #tpu.memory_space<vmem>>, vector<32x32xbf16>
    %c0_1 = arith.constant 0 : index
    %c0_2 = arith.constant 0 : index
    %1 = vector.load %arg1[%c0_1, %c0_2] : memref<32x128xbf16, #tpu.memory_space<vmem>>, vector<32x128xbf16>
    %cst = arith.constant dense<0.000000e+00> : vector<32x128xf32>
    %2 = tpu.matmul %0, %1, %cst {dimension_numbers = #tpu.dot_dimension_numbers<[1], [0], [0], [1], [0, 0, 1, 1], [], []>} : vector<32x32xbf16>, vector<32x128xbf16>, vector<32x128xf32> -> vector<32x128xf32>
    %c0_3 = arith.constant 0 : index
    %c0_4 = arith.constant 0 : index
    %3 = vector.load %arg5[%c0_3, %c0_4] : memref<32x1xf32, #tpu.memory_space<vmem>>, vector<32x1xf32>
    %4 = vector.broadcast %3 : vector<32x1xf32> to vector<32x128xf32>
    %5 = arith.addf %2, %4 : vector<32x128xf32>
    %c0_5 = arith.constant 0 : index
    %c0_6 = arith.constant 0 : index
    %6 = vector.load %arg2[%c0_5, %c0_6] : memref<1x128xi32, #tpu.memory_space<vmem>>, vector<1x128xi32>
    %c0_7 = arith.constant 0 : index
    %c0_8 = arith.constant 0 : index
    %7 = vector.load %arg3[%c0_7, %c0_8] : memref<1x128xf32, #tpu.memory_space<vmem>>, vector<1x128xf32>
    %8 = tpu.iota {dimensions = array<i32: 0>} : vector<8x128xi32>
    %9 = vector.broadcast %6 : vector<1x128xi32> to vector<8x128xi32>
    %10 = arith.cmpi eq, %8, %9 : vector<8x128xi32>
    %11 = vector.extract_strided_slice %5 {offsets = [0, 0], sizes = [8, 128], strides = [1, 1]} : vector<32x128xf32> to vector<8x128xf32>
    %cst_9 = arith.constant 0.000000e+00 : f32
    %12 = vector.broadcast %cst_9 : f32 to vector<8x128xf32>
    %13 = arith.select %10, %11, %12 : vector<8x128xi1>, vector<8x128xf32>
    %cst_10 = arith.constant dense<0.000000e+00> : vector<128xf32>
    %14 = vector.multi_reduction <add>, %13, %cst_10 [0] : vector<8x128xf32> to vector<128xf32>
    %15 = vector.shape_cast %14 : vector<128xf32> to vector<1x128xf32>
    %16 = arith.addf %15, %7 : vector<1x128xf32>
    %c0_11 = arith.constant 0 : index
    %c0_12 = arith.constant 0 : index
    %c0_13 = arith.constant 0 : index
    %17 = vector.load %arg6[%c0_11, %c0_12, %c0_13] : memref<1x4x128xf32, #tpu.memory_space<vmem>>, vector<1x1x128xf32>
    %18 = vector.shape_cast %17 : vector<1x1x128xf32> to vector<1x128xf32>
    %19 = vector.shape_cast %16 : vector<1x128xf32> to vector<1x1x128xf32>
    tpu.vector_store %arg6[%c0_11, %c0_12, %c0_13], %19 {strides = array<i32>} : memref<1x4x128xf32, #tpu.memory_space<vmem>>, vector<1x1x128xf32>,
    %20 = vector.extract_strided_slice %5 {offsets = [8, 0], sizes = [8, 128], strides = [1, 1]} : vector<32x128xf32> to vector<8x128xf32>
    %cst_14 = arith.constant 0.000000e+00 : f32
    %21 = vector.broadcast %cst_14 : f32 to vector<8x128xf32>
    %22 = arith.select %10, %20, %21 : vector<8x128xi1>, vector<8x128xf32>
    %cst_15 = arith.constant dense<0.000000e+00> : vector<128xf32>
    %23 = vector.multi_reduction <add>, %22, %cst_15 [0] : vector<8x128xf32> to vector<128xf32>
    %24 = vector.shape_cast %23 : vector<128xf32> to vector<1x128xf32>
    %25 = arith.addf %24, %7 : vector<1x128xf32>
    %c0_16 = arith.constant 0 : index
    %c1 = arith.constant 1 : index
    %c0_17 = arith.constant 0 : index
    %26 = vector.load %arg6[%c0_16, %c1, %c0_17] : memref<1x4x128xf32, #tpu.memory_space<vmem>>, vector<1x1x128xf32>
    %27 = vector.shape_cast %26 : vector<1x1x128xf32> to vector<1x128xf32>
    %28 = vector.shape_cast %25 : vector<1x128xf32> to vector<1x1x128xf32>
    tpu.vector_store %arg6[%c0_16, %c1, %c0_17], %28 {strides = array<i32>} : memref<1x4x128xf32, #tpu.memory_space<vmem>>, vector<1x1x128xf32>,
    %29 = vector.extract_strided_slice %5 {offsets = [16, 0], sizes = [8, 128], strides = [1, 1]} : vector<32x128xf32> to vector<8x128xf32>
    %cst_18 = arith.constant 0.000000e+00 : f32
    %30 = vector.broadcast %cst_18 : f32 to vector<8x128xf32>
    %31 = arith.select %10, %29, %30 : vector<8x128xi1>, vector<8x128xf32>
    %cst_19 = arith.constant dense<0.000000e+00> : vector<128xf32>
    %32 = vector.multi_reduction <add>, %31, %cst_19 [0] : vector<8x128xf32> to vector<128xf32>
    %33 = vector.shape_cast %32 : vector<128xf32> to vector<1x128xf32>
    %34 = arith.addf %33, %7 : vector<1x128xf32>
    %c0_20 = arith.constant 0 : index
    %c2 = arith.constant 2 : index
    %c0_21 = arith.constant 0 : index
    %35 = vector.load %arg6[%c0_20, %c2, %c0_21] : memref<1x4x128xf32, #tpu.memory_space<vmem>>, vector<1x1x128xf32>
    %36 = vector.shape_cast %35 : vector<1x1x128xf32> to vector<1x128xf32>
    %37 = vector.shape_cast %34 : vector<1x128xf32> to vector<1x1x128xf32>
    tpu.vector_store %arg6[%c0_20, %c2, %c0_21], %37 {strides = array<i32>} : memref<1x4x128xf32, #tpu.memory_space<vmem>>, vector<1x1x128xf32>,
    %38 = vector.extract_strided_slice %5 {offsets = [24, 0], sizes = [8, 128], strides = [1, 1]} : vector<32x128xf32> to vector<8x128xf32>
    %cst_22 = arith.constant 0.000000e+00 : f32
    %39 = vector.broadcast %cst_22 : f32 to vector<8x128xf32>
    %40 = arith.select %10, %38, %39 : vector<8x128xi1>, vector<8x128xf32>
    %cst_23 = arith.constant dense<0.000000e+00> : vector<128xf32>
    %41 = vector.multi_reduction <add>, %40, %cst_23 [0] : vector<8x128xf32> to vector<128xf32>
    %42 = vector.shape_cast %41 : vector<128xf32> to vector<1x128xf32>
    %43 = arith.addf %42, %7 : vector<1x128xf32>
    %c0_24 = arith.constant 0 : index
    %c3 = arith.constant 3 : index
    %c0_25 = arith.constant 0 : index
    %44 = vector.load %arg6[%c0_24, %c3, %c0_25] : memref<1x4x128xf32, #tpu.memory_space<vmem>>, vector<1x1x128xf32>
    %45 = vector.shape_cast %44 : vector<1x1x128xf32> to vector<1x128xf32>
    %46 = vector.shape_cast %43 : vector<1x128xf32> to vector<1x1x128xf32>
    tpu.vector_store %arg6[%c0_24, %c3, %c0_25], %46 {strides = array<i32>} : memref<1x4x128xf32, #tpu.memory_space<vmem>>, vector<1x1x128xf32>,
    return
  }
  func.func @transform_0(%arg0: i32) -> (i32, i32) {
    %c0_i32 = arith.constant 0 : i32
    %c0_i32_0 = arith.constant 0 : i32
    return %c0_i32, %arg0 : i32, i32
  }
  func.func @transform_1(%arg0: i32) -> (i32, i32) {
    %c0_i32 = arith.constant 0 : i32
    %c0_i32_0 = arith.constant 0 : i32
    return %c0_i32, %arg0 : i32, i32
  }
  func.func @transform_2(%arg0: i32) -> (i32, i32) {
    %c0_i32 = arith.constant 0 : i32
    %c0_i32_0 = arith.constant 0 : i32
    return %c0_i32, %arg0 : i32, i32
  }
  func.func @transform_3(%arg0: i32) -> (i32, i32) {
    %c0_i32 = arith.constant 0 : i32
    %c0_i32_0 = arith.constant 0 : i32
    %c0_i32_1 = arith.constant 0 : i32
    return %c0_i32, %c0_i32_0 : i32, i32
  }
  func.func @transform_4(%arg0: i32) -> (i32, i32) {
    %c0_i32 = arith.constant 0 : i32
    %c0_i32_0 = arith.constant 0 : i32
    %c0_i32_1 = arith.constant 0 : i32
    return %c0_i32, %c0_i32_0 : i32, i32
  }
  func.func @transform_5(%arg0: i32) -> (i32, i32, i32) {
    %c0_i32 = arith.constant 0 : i32
    %c0_i32_0 = arith.constant 0 : i32
    %c0_i32_1 = arith.constant 0 : i32
    return %arg0, %c0_i32, %c0_i32_0 : i32, i32, i32
  }
}

</mosaic_0001>

<bundles_post_ra>
// kernel: grammar_rule_mapper_forward.1
= control target key start
LH: loop header
LB: loop body
LE: loop exit
PB: predicated region body
PF: predicated region fallthrough
CT: control target
= control target key end

     0   :  { %v206_v1 = vmov 0   ;;  %vm75_vm0 = vcmask 261120   ;;  %v133_v9 = vlaneseq  ;;  %s285_s0 = inlined_call_operand.vmem [shape: bf16[32,128], index: 0, kind: input, shape index: {}]   ;;  %s286_s3 = inlined_call_operand.vmem [shape: bf16[32,32], index: 3, kind: input, shape index: {}]   ;;  %s287_s4 = inlined_call_operand.vmem [shape: f32[32,1], index: 4, kind: input, shape index: {}]   ;;  %s288_s1 = inlined_call_operand.vmem [shape: s32[1,128], index: 1, kind: input, shape index: {}]   ;;  %s289_s2 = inlined_call_operand.vmem [shape: f32[1,128], index: 2, kind: input, shape index: {}]   ;;  %s290_s5 = inlined_call_operand.vmem [shape: f32[1,4,128], index: 5, kind: output, shape index: {}]  }
   0x1   :  { %v202_v0 = vld [vmem:[%s285_s0] sm:$0xff]   ;;  %201 = vset.pattern.permute.xlu1 %v206_v1  ;;  %200 = vset.pattern.permute.xlu0 %v206_v1  ;;  %v203_v2 = vld [vmem:[%s285_s0 + $0x8] sm:$0xff]   ;;  %v31_v4 = vld [vmem:[%s287_s4 + $0x10] sm:$0xff] }
   0x2   :  { %191 = vmatprep.subr.bf16.mxu0 %v202_v0  ;;  %v204_v3 = vld [vmem:[%s286_s3] sm:$0xff]   ;;  %45 = vperm.xlu1 %201, %v31_v4   ;;  %v205_v6 = vld [vmem:[%s286_s3 + $0x8] sm:$0xff]   ;;  %v32_v7 = vld [vmem:[%s287_s4 + $0x18] sm:$0xff]  ;;  %v134_v11 = vshrl.u32 %v133_v9, 7 }
   0x3   :  { %192 = vmatpush3.bf16.msra.mxu0 %v202_v0  ;;  %195 = vmatprep.mubr.msk.bf16.mxu0 %vm75_vm0, %v204_v3  ;;  %v29_v5 = vld [vmem:[%s287_s4] sm:$0xff]  ;;  %v30_v8 = vld [vmem:[%s287_s4 + $0x8] sm:$0xff] }
   0x4   :  { %193 = vmatprep.subr.bf16.mxu0 %v203_v2  ;;  %35 = vperm.xlu0 %200, %v29_v5   ;;  %v186_v13 = vld [vmem:[%s288_s1] ss:$0 sm:$0xff] }
   0x5   :  { %vm139_vm1 = vcmp.eq.s32.totalorder %v134_v11, %v186_v13  ;;  %v132_v44 = vld [vmem:[%s289_s2] sm:$0x1] }
   0x6   :  { %50 = vperm.xlu1 %201, %v32_v7  }
   0x7   :  { %194 = vmatpush3.bf16.msra.mxu0 %v203_v2 }
   0x8   :  { %40 = vperm.xlu0 %200, %v30_v8  }
   0xa   :  { %196 = vmatmul.mubr.msk.bf16.vlgmr.msra.gmra.mrb[0].mxu0 %vm75_vm0, %v205_v6 }
  0x81   :  { %v46_v10 = vpop.permute.xlu1 %45 }
  0x83   :  { %v36_v12 = vpop.permute.xlu0 %35 }
  0x85   :  { %v51_v17 = vpop.permute.xlu1 %50 }
  0x87   :  { %v41_v20 = vpop.permute.xlu0 %40 }
  0xdd   :  { %v197_v14 = vpop.f32.mrb[0].mxu0 }
  0xde   :  { %v125_v15 = vadd.f32 %v197_v14, %v46_v10  ;;  %v116_v16 = vpop.f32.mrb[1].mxu0 }
  0xdf   :  { %v117_v18 = vadd.f32 %v116_v16, %v36_v12  ;;  %v198_v19 = vpop.f32.mrb[2].mxu0 }
  0xe0   :  { %v158_v21 = vsel %vm139_vm1, %v125_v15, 0.0  ;;  %v128_v22 = vadd.f32 %v198_v19, %v51_v17  ;;  %v119_v23 = vpop.f32.mrb[3].mxu0 }
  0xe1   :  { %v159_v24 = vrot.slane %v158_v21, 4  ;;  %v140_v25 = vsel %vm139_vm1, %v117_v18, 0.0  ;;  %v120_v26 = vadd.f32 %v119_v23, %v41_v20 }
  0xe2   :  { %v141_v27 = vrot.slane %v140_v25, 4  ;;  %v167_v28 = vsel %vm139_vm1, %v128_v22, 0.0 }
  0xe3   :  { %v160_v29 = vadd.f32 %v159_v24, %v158_v21  ;;  %v168_v30 = vrot.slane %v167_v28, 4  ;;  %v149_v31 = vsel %vm139_vm1, %v120_v26, 0.0 }
  0xe4   :  { %v142_v32 = vadd.f32 %v141_v27, %v140_v25  ;;  %v150_v33 = vrot.slane %v149_v31, 4 }
  0xe5   :  { %v161_v34 = vrot.slane %v160_v29, 2  ;;  %v169_v35 = vadd.f32 %v168_v30, %v167_v28 }
  0xe6   :  { %v143_v36 = vrot.slane %v142_v32, 2  ;;  %v151_v37 = vadd.f32 %v150_v33, %v149_v31 }
  0xe7   :  { %v162_v38 = vadd.f32 %v161_v34, %v160_v29  ;;  %v170_v39 = vrot.slane %v169_v35, 2 }
  0xe8   :  { %v144_v40 = vadd.f32 %v143_v36, %v142_v32  ;;  %v152_v41 = vrot.slane %v151_v37, 2 }
  0xe9   :  { %v163_v42 = vrot.slane %v162_v38, 1  ;;  %v171_v43 = vadd.f32 %v170_v39, %v169_v35 }
  0xea   :  { %v145_v45 = vrot.slane %v144_v40, 1  ;;  %v153_v46 = vadd.f32 %v152_v41, %v151_v37 }
  0xeb   :  { %v164_v47 = vadd.f32 %v163_v42, %v162_v38  ;;  %v172_v48 = vrot.slane %v171_v43, 1 }
  0xec   :  { %v146_v49 = vadd.f32 %v145_v45, %v144_v40  ;;  %v154_v50 = vrot.slane %v153_v46, 1 }
  0xed   :  { %v165_v51 = vadd.f32 %v164_v47, %v132_v44  ;;  %v173_v52 = vadd.f32 %v172_v48, %v171_v43 }
  0xee   :  { %v147_v53 = vadd.f32 %v146_v49, %v132_v44  ;;  %v155_v54 = vadd.f32 %v154_v50, %v153_v46 }
  0xef   :  { %166 = vst [vmem:[%s290_s5 + $0x2] sm:$0x1] %v165_v51  ;;  %v174_v55 = vadd.f32 %v173_v52, %v132_v44 }
  0xf0   :  { %148 = vst [vmem:[%s290_s5] sm:$0x1] %v147_v53  ;;  %v156_v56 = vadd.f32 %v155_v54, %v132_v44 }
  0xf1   :  { %175 = vst [vmem:[%s290_s5 + $0x3] sm:$0x1] %v174_v55 }
  0xf2   :  { %157 = vst [vmem:[%s290_s5 + $0x1] sm:$0x1] %v156_v56 }

</bundles_post_ra>
